<compile_context>
chip_gen: v7x
topology: tpu7x:2x2x1
jax: 0.10.0
libtpu: 0.0.40
codegen_flags: <defaults>
</compile_context>

<pallas_src>
import jax
import jax.numpy as jnp
from jax.experimental import pallas as pl
from jax.experimental.pallas import tpu as pltpu

ACTOR_FC1_UNITS = 400
ACTOR_FC2_UNITS = 300
BN_EPS = 1e-5


def _round_up(x, m):
    return (x + m - 1) // m * m


# ---------------------------------------------------------------------------
# Kernel
# ---------------------------------------------------------------------------
def actor_kernel(x_ref, w1_ref, bn_ref, w2_ref, b23_ref, w3_ref, out_ref):
    x = x_ref[...]

    # Unpack packed per-feature parameter slabs (static slices: zero cost).
    b1 = bn_ref[0:1, :]
    gamma = bn_ref[1:2, :]
    beta = bn_ref[2:3, :]
    b2 = b23_ref[0:1, :]
    b3 = b23_ref[1:2, :out_ref.shape[1]]

    # ---- fc1 + relu (MXU, f32 accumulation) ----
    h1 = jnp.dot(x.astype(w1_ref.dtype), w1_ref[...],
                 preferred_element_type=jnp.float32)
    h1 = jnp.maximum(h1 + b1, 0.0)

    # ---- BatchNorm1d, training mode (batch statistics, biased variance) ----
    # One-pass stats: both sublane (axis=0) reductions are independent, and
    # the affine is folded into a single per-feature scale.
    inv_n = 1.0 / h1.shape[0]
    s1 = jnp.sum(h1, axis=0, keepdims=True)
    s2 = jnp.sum(h1 * h1, axis=0, keepdims=True)
    mean = s1 * inv_n
    var = jnp.maximum(s2 * inv_n - mean * mean, 0.0)   # guard fp round-off
    scale = jax.lax.rsqrt(var + BN_EPS) * gamma        # fused [1, F1] scale
    h1 = (h1 - mean) * scale + beta

    # ---- fc2 + relu ----
    h2 = jnp.dot(h1.astype(w2_ref.dtype), w2_ref[...],
                 preferred_element_type=jnp.float32)
    h2 = jnp.maximum(h2 + b2, 0.0)

    # ---- fc3 + tanh ----
    out = jnp.dot(h2.astype(w3_ref.dtype), w3_ref[...],
                  preferred_element_type=jnp.float32)
    out_ref[...] = jnp.tanh(out + b3)


# ---------------------------------------------------------------------------
# Parameter init (mirrors Actor.reset_parameters) and kernel-layout packing
# ---------------------------------------------------------------------------
def init_actor_params(key, input_dim, output_dim,
                      fc1_units=ACTOR_FC1_UNITS, fc2_units=ACTOR_FC2_UNITS):
    """Deterministic init mirroring Actor.reset_parameters().

    NOTE: hidden_init uses weight.size()[0] == out_features (a quirk of the
    original code); we reproduce the same limits.  Weights are stored
    pre-transposed as [in, out] so the kernel computes x @ W + b.
    """
    ks = jax.random.split(key, 8)

    def u(k, shape, lim):
        return jax.random.uniform(k, shape, jnp.float32, -lim, lim)

    lim1 = 1.0 / jnp.sqrt(float(fc1_units))   # hidden_init(fc1)
    lim2 = 1.0 / jnp.sqrt(float(fc2_units))   # hidden_init(fc2)
    lim3 = 0.003

    # PyTorch Linear default bias init: U(-1/sqrt(in_features), +1/sqrt(in_features))
    blim1 = 1.0 / jnp.sqrt(float(input_dim))
    blim2 = 1.0 / jnp.sqrt(float(fc1_units))
    blim3 = 1.0 / jnp.sqrt(float(fc2_units))

    return {
        "w1": u(ks[0], (input_dim, fc1_units), lim1),
        "b1": u(ks[1], (1, fc1_units), blim1),
        "gamma": jnp.ones((1, fc1_units), jnp.float32),   # BatchNorm1d weight
        "beta": jnp.zeros((1, fc1_units), jnp.float32),   # BatchNorm1d bias
        "w2": u(ks[2], (fc1_units, fc2_units), lim2),
        "b2": u(ks[3], (1, fc2_units), blim2),
        "w3": u(ks[4], (fc2_units, output_dim), lim3),
        "b3": u(ks[5], (1, output_dim), blim3),
    }


def prepare_actor_params(params, matmul_dtype=jnp.float32):
    """Pad feature dims to lane multiples and pack small per-feature rows."""
    din, f1 = params["w1"].shape
    f2 = params["w2"].shape[1]
    dout = params["w3"].shape[1]
    f1p = _round_up(f1, 128)
    f2p = _round_up(f2, 128)
    doutp = _round_up(dout, 128)

    def pad2(a, rows, cols):
        return jnp.pad(a, ((0, rows - a.shape[0]), (0, cols - a.shape[1])))

    w1 = pad2(params["w1"], din, f1p).astype(matmul_dtype)
    w2 = pad2(params["w2"], f1p, f2p).astype(matmul_dtype)
    w3 = pad2(params["w3"], f2p, doutp).astype(matmul_dtype)

    # [3, F1p] slab: row0 = b1, row1 = gamma, row2 = beta.  Padded columns get
    # gamma = beta = 0 so they stay exactly zero through BN.
    bn = jnp.concatenate([pad2(params["b1"], 1, f1p),
                          pad2(params["gamma"], 1, f1p),
                          pad2(params["beta"], 1, f1p)], axis=0).astype(jnp.float32)

    # [2, F2p] slab: row0 = b2; row1 = b3 (occupying the first doutp columns).
    b3_row = jnp.zeros((1, f2p), jnp.float32).at[:, :dout].set(params["b3"])
    b23 = jnp.concatenate([pad2(params["b2"], 1, f2p), b3_row], axis=0)

    return {"w1": w1, "w2": w2, "w3": w3, "bn": bn, "b23": b23,
            "dims": (din, f1, f2, dout, f1p, f2p, doutp)}


# ---------------------------------------------------------------------------
# Wrapper
# ---------------------------------------------------------------------------
def actor_forward(x, prepared):
    """x: [B, input_dim] (or [input_dim]) f32; prepared: prepare_actor_params()."""
    if x.ndim == 1:                      # mirrors `if state.dim() == 1: unsqueeze(0)`
        x = x[None, :]
    B = x.shape[0]
    din, f1, f2, dout, f1p, f2p, doutp = prepared["dims"]

    args = (x, prepared["w1"], prepared["bn"], prepared["w2"],
            prepared["b23"], prepared["w3"])

    flops = 2 * B * (din * f1p + f1p * f2p + f2p * doutp)
    transcendentals = f1p + B * doutp                      # rsqrt + tanh
    bytes_accessed = (sum(int(a.size) * a.dtype.itemsize for a in args)
                      + B * doutp * 4)

    vmem = pl.BlockSpec(memory_space=pltpu.MemorySpace.VMEM)
    out_padded = pl.pallas_call(
        actor_kernel,
        out_shape=jax.ShapeDtypeStruct((B, doutp), jnp.float32),
        in_specs=[vmem] * len(args),
        out_specs=vmem,
        cost_estimate=pl.CostEstimate(flops=flops,
                                      transcendentals=transcendentals,
                                      bytes_accessed=bytes_accessed),
    )(*args)
    return out_padded[:, :dout]


def actor_reference(x, params):
    """Pure-JAX reference (two-pass BN var) for correctness check."""
    if x.ndim == 1:
        x = x[None, :]
    h1 = jnp.maximum(x @ params["w1"] + params["b1"], 0.0)
    mean = jnp.mean(h1, axis=0, keepdims=True)
    var = jnp.mean((h1 - mean) ** 2, axis=0, keepdims=True)
    h1 = (h1 - mean) * jax.lax.rsqrt(var + BN_EPS) * params["gamma"] + params["beta"]
    h2 = jnp.maximum(h1 @ params["w2"] + params["b2"], 0.0)
    return jnp.tanh(h2 @ params["w3"] + params["b3"])


if __name__ == "__main__":
    key = jax.random.PRNGKey(0)
    k_param, k_x = jax.random.split(key)

    # Tennis env (Collaboration & Competition project): state=24, action=2.
    input_dim, output_dim, batch = 24, 2, 8

    params = init_actor_params(k_param, input_dim, output_dim)
    x = jax.random.normal(k_x, (batch, input_dim), jnp.float32)

    # f32 path (faithful to the PyTorch module's numerics).
    prepared = prepare_actor_params(params, matmul_dtype=jnp.float32)
    out = jax.block_until_ready(actor_forward(x, prepared))
    ref = actor_reference(x, params)
    assert out.shape == (batch, output_dim)
    assert jnp.allclose(out, ref, atol=1e-4, rtol=1e-4), \
        f"max abs err {float(jnp.max(jnp.abs(out - ref)))}"

    # bf16 matmul-input path (recommended on v6e/v7x): halves weight DMA bytes;
    # BN / ReLU / tanh and MXU accumulation remain f32.
    prepared_bf16 = prepare_actor_params(params, matmul_dtype=jnp.bfloat16)
    out_bf16 = jax.block_until_ready(actor_forward(x, prepared_bf16))
    assert out_bf16.shape == (batch, output_dim)
    assert bool(jnp.all(jnp.isfinite(out_bf16)))

    print("KERNEL_OK")
</pallas_src>

<mosaic_0001>
module attributes {stable_mosaic.version = 11 : i64} {
  func.func @actor_kernel(%arg0: memref<8x24xf32, #tpu.memory_space<vmem>>, %arg1: memref<24x512xf32, #tpu.memory_space<vmem>>, %arg2: memref<3x512xf32, #tpu.memory_space<vmem>>, %arg3: memref<512x384xf32, #tpu.memory_space<vmem>>, %arg4: memref<2x384xf32, #tpu.memory_space<vmem>>, %arg5: memref<384x128xf32, #tpu.memory_space<vmem>>, %arg6: memref<8x128xf32, #tpu.memory_space<vmem>>) attributes {dimension_semantics = [], scalar_prefetch = 0 : i64, scratch_operands = 0 : i64, tpu.core_type = #tpu.core_type<tc>} {
    %c0 = arith.constant 0 : index
    %c0_0 = arith.constant 0 : index
    %0 = vector.load %arg0[%c0, %c0_0] : memref<8x24xf32, #tpu.memory_space<vmem>>, vector<8x24xf32>
    %c0_1 = arith.constant 0 : index
    %c0_2 = arith.constant 0 : index
    %1 = vector.load %arg2[%c0_1, %c0_2] : memref<3x512xf32, #tpu.memory_space<vmem>>, vector<1x512xf32>
    %c1 = arith.constant 1 : index
    %c0_3 = arith.constant 0 : index
    %2 = vector.load %arg2[%c1, %c0_3] : memref<3x512xf32, #tpu.memory_space<vmem>>, vector<1x512xf32>
    %c2 = arith.constant 2 : index
    %c0_4 = arith.constant 0 : index
    %3 = vector.load %arg2[%c2, %c0_4] : memref<3x512xf32, #tpu.memory_space<vmem>>, vector<1x512xf32>
    %c0_5 = arith.constant 0 : index
    %c0_6 = arith.constant 0 : index
    %4 = vector.load %arg4[%c0_5, %c0_6] : memref<2x384xf32, #tpu.memory_space<vmem>>, vector<1x384xf32>
    %c1_7 = arith.constant 1 : index
    %c0_8 = arith.constant 0 : index
    %5 = vector.load %arg4[%c1_7, %c0_8] : memref<2x384xf32, #tpu.memory_space<vmem>>, vector<1x128xf32>
    %c0_9 = arith.constant 0 : index
    %c0_10 = arith.constant 0 : index
    %6 = vector.load %arg1[%c0_9, %c0_10] : memref<24x512xf32, #tpu.memory_space<vmem>>, vector<24x512xf32>
    %cst = arith.constant dense<0.000000e+00> : vector<8x512xf32>
    %7 = tpu.matmul %0, %6, %cst {dimension_numbers = #tpu.dot_dimension_numbers<[1], [0], [0], [1], [0, 0, 1, 1], [], []>} : vector<8x24xf32>, vector<24x512xf32>, vector<8x512xf32> -> vector<8x512xf32>
    %8 = vector.broadcast %1 : vector<1x512xf32> to vector<8x512xf32>
    %9 = arith.addf %7, %8 : vector<8x512xf32>
    %cst_11 = arith.constant 0.000000e+00 : f32
    %10 = vector.broadcast %cst_11 : f32 to vector<8x512xf32>
    %11 = arith.maximumf %9, %10 : vector<8x512xf32>
    %cst_12 = arith.constant dense<0.000000e+00> : vector<512xf32>
    %12 = vector.multi_reduction <add>, %11, %cst_12 [0] : vector<8x512xf32> to vector<512xf32>
    %13 = vector.shape_cast %12 : vector<512xf32> to vector<1x512xf32>
    %14 = arith.mulf %11, %11 : vector<8x512xf32>
    %cst_13 = arith.constant dense<0.000000e+00> : vector<512xf32>
    %15 = vector.multi_reduction <add>, %14, %cst_13 [0] : vector<8x512xf32> to vector<512xf32>
    %16 = vector.shape_cast %15 : vector<512xf32> to vector<1x512xf32>
    %cst_14 = arith.constant 1.250000e-01 : f32
    %17 = vector.broadcast %cst_14 : f32 to vector<1x512xf32>
    %18 = arith.mulf %13, %17 : vector<1x512xf32>
    %cst_15 = arith.constant 1.250000e-01 : f32
    %19 = vector.broadcast %cst_15 : f32 to vector<1x512xf32>
    %20 = arith.mulf %16, %19 : vector<1x512xf32>
    %21 = arith.mulf %18, %18 : vector<1x512xf32>
    %22 = arith.subf %20, %21 : vector<1x512xf32>
    %cst_16 = arith.constant 0.000000e+00 : f32
    %23 = vector.broadcast %cst_16 : f32 to vector<1x512xf32>
    %24 = arith.maximumf %22, %23 : vector<1x512xf32>
    %cst_17 = arith.constant 9.99999974E-6 : f32
    %25 = vector.broadcast %cst_17 : f32 to vector<1x512xf32>
    %26 = arith.addf %24, %25 : vector<1x512xf32>
    %27 = math.rsqrt %26 : vector<1x512xf32>
    %28 = arith.mulf %27, %2 : vector<1x512xf32>
    %29 = vector.broadcast %18 : vector<1x512xf32> to vector<8x512xf32>
    %30 = arith.subf %11, %29 : vector<8x512xf32>
    %31 = vector.broadcast %28 : vector<1x512xf32> to vector<8x512xf32>
    %32 = arith.mulf %30, %31 : vector<8x512xf32>
    %33 = vector.broadcast %3 : vector<1x512xf32> to vector<8x512xf32>
    %34 = arith.addf %32, %33 : vector<8x512xf32>
    %c0_18 = arith.constant 0 : index
    %c0_19 = arith.constant 0 : index
    %35 = vector.load %arg3[%c0_18, %c0_19] : memref<512x384xf32, #tpu.memory_space<vmem>>, vector<512x384xf32>
    %cst_20 = arith.constant dense<0.000000e+00> : vector<8x384xf32>
    %36 = tpu.matmul %34, %35, %cst_20 {dimension_numbers = #tpu.dot_dimension_numbers<[1], [0], [0], [1], [0, 0, 1, 1], [], []>} : vector<8x512xf32>, vector<512x384xf32>, vector<8x384xf32> -> vector<8x384xf32>
    %37 = vector.broadcast %4 : vector<1x384xf32> to vector<8x384xf32>
    %38 = arith.addf %36, %37 : vector<8x384xf32>
    %cst_21 = arith.constant 0.000000e+00 : f32
    %39 = vector.broadcast %cst_21 : f32 to vector<8x384xf32>
    %40 = arith.maximumf %38, %39 : vector<8x384xf32>
    %c0_22 = arith.constant 0 : index
    %c0_23 = arith.constant 0 : index
    %41 = vector.load %arg5[%c0_22, %c0_23] : memref<384x128xf32, #tpu.memory_space<vmem>>, vector<384x128xf32>
    %cst_24 = arith.constant dense<0.000000e+00> : vector<8x128xf32>
    %42 = tpu.matmul %40, %41, %cst_24 {dimension_numbers = #tpu.dot_dimension_numbers<[1], [0], [0], [1], [0, 0, 1, 1], [], []>} : vector<8x384xf32>, vector<384x128xf32>, vector<8x128xf32> -> vector<8x128xf32>
    %43 = vector.broadcast %5 : vector<1x128xf32> to vector<8x128xf32>
    %44 = arith.addf %42, %43 : vector<8x128xf32>
    %45 = math.tanh %44 : vector<8x128xf32>
    %c0_25 = arith.constant 0 : index
    %c0_26 = arith.constant 0 : index
    %46 = vector.load %arg6[%c0_25, %c0_26] : memref<8x128xf32, #tpu.memory_space<vmem>>, vector<8x128xf32>
    tpu.vector_store %arg6[%c0_25, %c0_26], %45 {strides = array<i32>} : memref<8x128xf32, #tpu.memory_space<vmem>>, vector<8x128xf32>,
    return
  }
}

</mosaic_0001>

<bundles_post_ra>
// kernel: tpu_custom_call.1
= control target key start
LH: loop header
LB: loop body
LE: loop exit
PB: predicated region body
PF: predicated region fallthrough
CT: control target
= control target key end

     0   :  { %11 = vsyncpa [#allocation3], 0  ;;  %s1932_s0 = inlined_call_operand.hbm [shape: f32[8,24], index: 0, kind: input, shape index: {}]   ;;  %s1933_s1 = inlined_call_operand.hbm [shape: f32[24,512], index: 1, kind: input, shape index: {}]   ;;  %s1934_s2 = inlined_call_operand.hbm [shape: f32[3,512], index: 2, kind: input, shape index: {}]   ;;  %s1935_s3 = inlined_call_operand.hbm [shape: f32[512,384], index: 3, kind: input, shape index: {}]   ;;  %s1936_s4 = inlined_call_operand.vmem [shape: f32[2,384], index: 4, kind: input, shape index: {}]   ;;  %s1937_s5 = inlined_call_operand.hbm [shape: f32[384,128], index: 5, kind: input, shape index: {}]   ;;  %s1938_s6 = inlined_call_operand.hbm [shape: f32[8,128], index: 6, kind: output, shape index: {}]  }
   0x1   :  { %12 = vsyncpa [#allocation6], 0 }
   0x2   :  { %13 = vsyncpa [#allocation9], 0 }
   0x3   :  { %14 = vsyncpa [#allocation4], 0  ;;  %s1722_s21 = smov [#allocation5]   ;;  %s1582_s25 = scalar_lea.hbm %s1933_s1, 1536 }
   0x4   :  { %s30_s22 = sshll.u32 %s1722_s21, 4  ;;  %p1583_p0 = scmp.ne.s32.totalorder %s1933_s1, %s1582_s25  ;;  %s31_s22 = int_to_ptr.vmem [resolvable:$true] %s30_s22 }
   0x5   :  { %p1586_p1 = scmp.lt.u32.totalorder %s1582_s25, %s1933_s1 }
   0x7   :  { %p1588_p2 = pnand %p1586_p1, %p1583_p0 }
   0x9   :  { %1591 = shalt.err (!%p1588_p2)
}
   0xa   :  { %s1592_s30 = scalar_lea.vmem %s31_s22, 1536  ;;  %p1597_p4 = scmp.lt.s32.totalorder %s31_s22, %s31_s22 }
   0xb   :  { %p1593_p3 = scmp.ne.s32.totalorder %s31_s22, %s1592_s30  ;;  %p1598_p5 = scmp.lt.s32.totalorder %s1592_s30, %s1592_s30 }
   0xd   :  { %p1599_p6 = por %p1598_p5, %p1597_p4 }
   0xf   :  { %p1600_p7 = pnand %p1599_p6, %p1593_p3 }
  0x11   :  { %1603 = shalt.err (!%p1600_p7)
}
  0x12   :  { %s1723_s7 = smov 512   ;;  %s1724_s8 = smov 32  }
  0x13   :  { %36 = dma.hbm_to_vmem [thread:$0]  %s1933_s1, 1536, %s31_s22, [#allocation6], %s1723_s7, %s1723_s7, %s1724_s8  }
  0x14   :  { %s1725_s11 = smov [#allocation8]   ;;  %s1604_s15 = scalar_lea.hbm %s1935_s3, 24576 }
  0x15   :  { %s52_s12 = sshll.u32 %s1725_s11, 4  ;;  %p1605_p8 = scmp.ne.s32.totalorder %s1935_s3, %s1604_s15  ;;  %s53_s12 = int_to_ptr.vmem [resolvable:$true] %s52_s12 }
  0x16   :  { %p1608_p9 = scmp.lt.u32.totalorder %s1604_s15, %s1935_s3 }
  0x18   :  { %p1610_p10 = pnand %p1608_p9, %p1605_p8 }
  0x1a   :  { %1613 = shalt.err (!%p1610_p10)
}
  0x1b   :  { %s1614_s20 = scalar_lea.vmem %s53_s12, 24576  ;;  %p1619_p12 = scmp.lt.s32.totalorder %s53_s12, %s53_s12 }
  0x1c   :  { %p1615_p11 = scmp.ne.s32.totalorder %s53_s12, %s1614_s20  ;;  %p1620_p13 = scmp.lt.s32.totalorder %s1614_s20, %s1614_s20 }
  0x1e   :  { %p1621_p0 = por %p1620_p13, %p1619_p12 }
  0x20   :  { %p1622_p1 = pnand %p1621_p0, %p1615_p11 }
  0x22   :  { %1625 = shalt.err (!%p1622_p1)
}
  0x23   :  { %s1726_s1 = smov 384   ;;  %s1727_s21 = smov 24  }
  0x24   :  { %58 = dma.hbm_to_vmem [thread:$0]  %s1935_s3, 24576, %s53_s12, [#allocation9], %s1726_s1, %s1726_s1, %s1727_s21  }
  0x25   :  { %s1728_s24 = smov [#allocation2]   ;;  %s1729_s26 = smov [#allocation7]  }
  0x26   :  { %s21_s25 = sshll.u32 %s1728_s24, 4  ;;  %s43_s27 = sshll.u32 %s1729_s26, 4  ;;  %s22_s25 = int_to_ptr.vmem [resolvable:$true] %s21_s25  ;;  %s44_s27 = int_to_ptr.vmem [resolvable:$true] %s43_s27 }
  0x27   :  { %s1626_s30 = scalar_lea.hbm %s1932_s0, 128 }
  0x28   :  { %p1627_p2 = scmp.ne.s32.totalorder %s1932_s0, %s1626_s30  ;;  %p1630_p3 = scmp.lt.u32.totalorder %s1626_s30, %s1932_s0 }
  0x2a   :  { %p1632_p4 = pnand %p1630_p3, %p1627_p2 }
  0x2c   :  { %1635 = shalt.err (!%p1632_p4)
}
  0x2d   :  { %s1636_s3 = scalar_lea.vmem %s22_s25, 128  ;;  %p1641_p6 = scmp.lt.s32.totalorder %s22_s25, %s22_s25 }
  0x2e   :  { %p1637_p5 = scmp.ne.s32.totalorder %s22_s25, %s1636_s3  ;;  %p1642_p7 = scmp.lt.s32.totalorder %s1636_s3, %s1636_s3 }
  0x30   :  { %p1643_p8 = por %p1642_p7, %p1641_p6 }
  0x32   :  { %p1644_p9 = pnand %p1643_p8, %p1637_p5 }
  0x34   :  { %1647 = shalt.err (!%p1644_p9)
}
  0x35   :  { %24 = dma.hbm_to_vmem [thread:$0]  %s1932_s0, 128, %s22_s25, [#allocation3]  }
  0x36   :  { %s1648_s15 = scalar_lea.hbm %s1934_s2, 256 }
  0x37   :  { %p1649_p10 = scmp.ne.s32.totalorder %s1934_s2, %s1648_s15  ;;  %p1652_p11 = scmp.lt.u32.totalorder %s1648_s15, %s1934_s2 }
  0x39   :  { %p1654_p12 = pnand %p1652_p11, %p1649_p10 }
  0x3b   :  { %1657 = shalt.err (!%p1654_p12)
}
  0x3c   :  { %s1658_s20 = scalar_lea.vmem %s44_s27, 256  ;;  %p1663_p0 = scmp.lt.s32.totalorder %s44_s27, %s44_s27 }
  0x3d   :  { %p1659_p13 = scmp.ne.s32.totalorder %s44_s27, %s1658_s20  ;;  %p1664_p1 = scmp.lt.s32.totalorder %s1658_s20, %s1658_s20 }
  0x3f   :  { %p1665_p2 = por %p1664_p1, %p1663_p0 }
  0x41   :  { %p1666_p3 = pnand %p1665_p2, %p1659_p13 }
  0x43   :  { %1669 = shalt.err (!%p1666_p3)
}
  0x44   :  { %46 = dma.hbm_to_vmem [thread:$0]  %s1934_s2, 256, %s44_s27, [#allocation6]  }
  0x45   :  { %s1730_s21 = smov [#allocation10]   ;;  %s1670_s25 = scalar_lea.hbm %s1937_s5, 6144 }
  0x46   :  { %s66_s22 = sshll.u32 %s1730_s21, 4  ;;  %p1671_p4 = scmp.ne.s32.totalorder %s1937_s5, %s1670_s25  ;;  %s67_s22 = int_to_ptr.vmem [resolvable:$true] %s66_s22 }
  0x47   :  { %p1674_p5 = scmp.lt.u32.totalorder %s1670_s25, %s1937_s5 }
  0x49   :  { %p1676_p6 = pnand %p1674_p5, %p1671_p4 }
  0x4b   :  { %1679 = shalt.err (!%p1676_p6)
}
  0x4c   :  { %s1680_s7 = scalar_lea.vmem %s67_s22, 6144  ;;  %p1685_p8 = scmp.lt.s32.totalorder %s67_s22, %s67_s22 }
  0x4d   :  { %p1681_p7 = scmp.ne.s32.totalorder %s67_s22, %s1680_s7  ;;  %p1686_p9 = scmp.lt.s32.totalorder %s1680_s7, %s1680_s7 }
  0x4f   :  { %p1687_p10 = por %p1686_p9, %p1685_p8 }
  0x51   :  { %p1688_p11 = pnand %p1687_p10, %p1681_p7 }
  0x53   :  { %1691 = shalt.err (!%p1688_p11)
}
  0x54   :  { %s1731_s2 = smov 128   ;;  %s1732_s27 = smov 8  }
  0x55   :  { %72 = dma.hbm_to_vmem [thread:$0]  %s1937_s5, 6144, %s67_s22, [#allocation9], %s1731_s2, %s1731_s2, %s1732_s27  }
  0x56   :  { %1714 = dma.done.wait [#allocation3], 128  }
  0x57   :  { %1715 = vsyncadd [#allocation3], 4294967168 }
  0x58   :  { %1716 = dma.done.wait [#allocation6], 1792  }
  0x59   :  { %1717 = vsyncadd [#allocation6], 4294965504 }
  0x5a   :  { %1718 = dma.done.wait [#allocation9], 30720  }
  0x5b   :  { %1719 = vsyncadd [#allocation9], 4294936576  ;;  %v1733_v0 = vmov 0.0   ;;  %v97_v1 = vld [vmem:[#allocation5 + $0x8] sm:$0xff]  ;;  %v96_v3 = vld [vmem:[#allocation5] sm:$0xff]  ;;  %vm129_vm0 = vcmask 195584  }
  0x5c   :  { %197 = vmatprep.mubr.f32.mxu0 %v1733_v0  ;;  %268 = vmatprep.mubr.f32.mxu1 %v1733_v0  ;;  %v101_v2 = vld [vmem:[#allocation5 + $0x28] sm:$0xff]  ;;  %v100_v5 = vld [vmem:[#allocation5 + $0x20] sm:$0xff]  ;;  %v99_v8 = vld [vmem:[#allocation5 + $0x18] sm:$0xff]  ;;  %vm1735_vm1 = vmmov 0   ;;  %s1736_s12 = smov [#allocation11]  }
  0x5d   :  { %v1297_v4 = vpack.c.bf16 %v101_v2, %v97_v1  ;;  %v1299_v6 = vpack.c.bf16 %v100_v5, %v96_v3  ;;  %v105_v7 = vld [vmem:[#allocation5 + $0x48] sm:$0xff]  ;;  %v103_v9 = vld [vmem:[#allocation5 + $0x38] sm:$0xff]  ;;  %v104_v10 = vld [vmem:[#allocation5 + $0x40] sm:$0xff]  ;;  %s1126_s13 = sshll.u32 %s1736_s12, 4  ;;  %s1127_s13 = int_to_ptr.vmem [resolvable:$true] %s1126_s13 }
  0x5e   :  { %v1301_v11 = vpack.c.bf16 %v103_v9, %v99_v8  ;;  %v98_v12 = vld [vmem:[#allocation5 + $0x10] sm:$0xff]  ;;  %v107_v15 = vld [vmem:[#allocation5 + $0x58] sm:$0xff]  ;;  %v436_v20 = vld [vmem:[#allocation8 + $0x18] sm:$0xff]  ;;  %s1692_s14 = scalar_lea.vmem %s1127_s13, 128  ;;  %p1697_p13 = scmp.lt.s32.totalorder %s1127_s13, %s1127_s13 }
  0x5f   :  { %1298 = vmatprep.subr.bf16.mxu0 %v1297_v4  ;;  %v102_v13 = vld [vmem:[#allocation5 + $0x30] sm:$0xff]  ;;  %v434_v16 = vld [vmem:[#allocation8 + $0x8] sm:$0xff]  ;;  %v440_v21 = vld [vmem:[#allocation8 + $0x38] sm:$0xff]  ;;  %p1693_p12 = scmp.ne.s32.totalorder %s1127_s13, %s1692_s14  ;;  %p1698_p0 = scmp.lt.s32.totalorder %s1692_s14, %s1692_s14 }
  0x60   :  { %1300 = vmatpush1.bf16.msra.mxu0 %v1299_v6  ;;  %v1303_v14 = vpack.c.bf16 %v102_v13, %v98_v12  ;;  %v437_v17 = vld [vmem:[#allocation8 + $0x20] sm:$0xff]  ;;  %1302 = vmatprep.subr.bf16.mxu1 %v1301_v11  ;;  %v88_v22 = vld [vmem:[#allocation2] sm:$0xff]  ;;  %v443_v24 = vld [vmem:[#allocation8 + $0x50] sm:$0xff] }
  0x61   :  { %137 = vmatprep.subr.mxu0 %v105_v7  ;;  %v1305_v18 = vpack.c.bf16 %v437_v17, %v434_v16  ;;  %v433_v19 = vld [vmem:[#allocation8] sm:$0xff]  ;;  %v1309_v26 = vpack.c.bf16 %v443_v24, %v440_v21  ;;  %v439_v27 = vld [vmem:[#allocation8 + $0x30] sm:$0xff]  ;;  %v442_v28 = vld [vmem:[#allocation8 + $0x48] sm:$0xff]  ;;  %p1699_p1 = por %p1698_p0, %p1697_p13 }
  0x62   :  { %1304 = vmatpush1.bf16.msra.mxu1 %v1303_v14  ;;  %v1307_v23 = vpack.c.bf16 %v436_v20, %v433_v19  ;;  %v106_v25 = vld [vmem:[#allocation5 + $0x50] sm:$0xff]  ;;  %v446_v29 = vld [vmem:[#allocation8 + $0x68] sm:$0xff]  ;;  %v1311_v31 = vpack.c.bf16 %v442_v28, %v439_v27  ;;  %v448_v34 = vld [vmem:[#allocation8 + $0x78] sm:$0xff] }
  0x63   :  { %208 = vmatprep.subr.mxu1 %v107_v15  ;;  %v449_v30 = vld [vmem:[#allocation8 + $0x80] sm:$0xff]  ;;  %v452_v35 = vld [vmem:[#allocation8 + $0x98] sm:$0xff]  ;;  %v455_v36 = vld [vmem:[#allocation8 + $0xb0] sm:$0xff]  ;;  %p1700_p2 = pnand %p1699_p1, %p1693_p12 }
  0x64   :  { %138 = vmatpush1.msra.mxu0 %v104_v10  ;;  %v1313_v32 = vpack.c.bf16 %v449_v30, %v446_v29  ;;  %v445_v33 = vld [vmem:[#allocation8 + $0x60] sm:$0xff]  ;;  %v1317_v38 = vpack.c.bf16 %v455_v36, %v452_v35  ;;  %v451_v39 = vld [vmem:[#allocation8 + $0x90] sm:$0xff]  ;;  %v454_v40 = vld [vmem:[#allocation8 + $0xa8] sm:$0xff] }
  0x65   :  { %1137 = vmatmul.mubr.msk.f32.vlgmr.msra.gmra.mrb[0].mxu0 %vm129_vm0, %v88_v22  ;;  %1306 = vmatprep.subr.bf16.mxu0 %v1305_v18  ;;  %v1315_v37 = vpack.c.bf16 %v448_v34, %v445_v33  ;;  %v458_v41 = vld [vmem:[#allocation8 + $0xc8] sm:$0xff]  ;;  %v461_v42 = vld [vmem:[#allocation8 + $0xe0] sm:$0xff]  ;;  %v1319_v43 = vpack.c.bf16 %v454_v40, %v451_v39  ;;  %v460_v46 = vld [vmem:[#allocation8 + $0xd8] sm:$0xff] }
  0x66   :  { %209 = vmatpush1.msra.mxu1 %v106_v25  ;;  %1308 = vmatpush1.bf16.msra.mxu0 %v1307_v23  ;;  %v1321_v44 = vpack.c.bf16 %v461_v42, %v458_v41  ;;  %v457_v45 = vld [vmem:[#allocation8 + $0xc0] sm:$0xff]  ;;  %v464_v48 = vld [vmem:[#allocation8 + $0xf8] sm:$0xff]  ;;  %v467_v49 = vld [vmem:[#allocation8 + $0x110] sm:$0xff] }
  0x67   :  { %1138 = vmatmul.mubr.msk.f32.vlgmr.msra.gmra.mrb[0].mxu1 %vm129_vm0, %v88_v22  ;;  %1310 = vmatprep.subr.bf16.mxu0 %v1309_v26  ;;  %v1323_v47 = vpack.c.bf16 %v460_v46, %v457_v45  ;;  %v1325_v50 = vpack.c.bf16 %v467_v49, %v464_v48  ;;  %v463_v51 = vld [vmem:[#allocation8 + $0xf0] sm:$0xff]  ;;  %v466_v52 = vld [vmem:[#allocation8 + $0x108] sm:$0xff]  ;;  %v473_v55 = vld [vmem:[#allocation8 + $0x140] sm:$0xff] }
  0x68   :  { %v1327_v53 = vpack.c.bf16 %v466_v52, %v463_v51  ;;  %v470_v54 = vld [vmem:[#allocation8 + $0x128] sm:$0xff]  ;;  %v469_v57 = vld [vmem:[#allocation8 + $0x120] sm:$0xff]  ;;  %v472_v58 = vld [vmem:[#allocation8 + $0x138] sm:$0xff] }
  0x69   :  { %v1329_v56 = vpack.c.bf16 %v473_v55, %v470_v54  ;;  %v1331_v59 = vpack.c.bf16 %v472_v58, %v469_v57  ;;  %v476_v60 = vld [vmem:[#allocation8 + $0x158] sm:$0xff]  ;;  %v479_v61 = vld [vmem:[#allocation8 + $0x170] sm:$0xff]  ;;  %v478_v1 = vld [vmem:[#allocation8 + $0x168] sm:$0xff] }
  0x6a   :  { %1312 = vmatpush1.bf16.msra.mxu0 %v1311_v31  ;;  %v1333_v62 = vpack.c.bf16 %v479_v61, %v476_v60  ;;  %v475_v63 = vld [vmem:[#allocation8 + $0x150] sm:$0xff]  ;;  %v482_v3 = vld [vmem:[#allocation8 + $0x188] sm:$0xff]  ;;  %v485_v4 = vld [vmem:[#allocation8 + $0x1a0] sm:$0xff] }
  0x6b   :  { %1314 = vmatprep.subr.bf16.mxu0 %v1313_v32  ;;  %v1335_v2 = vpack.c.bf16 %v478_v1, %v475_v63  ;;  %v483_v5 = vld [vmem:[#allocation8 + $0x190] sm:$0xff]  ;;  %v1337_v6 = vpack.c.bf16 %v485_v4, %v482_v3  ;;  %v486_v7 = vld [vmem:[#allocation8 + $0x1a8] sm:$0xff]  ;;  %v481_v8 = vld [vmem:[#allocation8 + $0x180] sm:$0xff] }
  0x6c   :  { %v484_v9 = vld [vmem:[#allocation8 + $0x198] sm:$0xff]  ;;  %v1433_v10 = vpack.c.bf16 %v486_v7, %v483_v5  ;;  %v435_v12 = vld [vmem:[#allocation8 + $0x10] sm:$0xff]  ;;  %v438_v13 = vld [vmem:[#allocation8 + $0x28] sm:$0xff] }
  0x6d   :  { %v1339_v11 = vpack.c.bf16 %v484_v9, %v481_v8  ;;  %v1435_v14 = vpack.c.bf16 %v438_v13, %v435_v12  ;;  %v488_v15 = vld [vmem:[#allocation8 + $0x1b8] sm:$0xff]  ;;  %v491_v16 = vld [vmem:[#allocation8 + $0x1d0] sm:$0xff]  ;;  %v489_v17 = vld [vmem:[#allocation8 + $0x1c0] sm:$0xff] }
  0x6e   :  { %1316 = vmatpush1.bf16.msra.mxu0 %v1315_v37  ;;  %1434 = vmatprep.subr.bf16.mxu1 %v1433_v10  ;;  %v1341_v18 = vpack.c.bf16 %v491_v16, %v488_v15  ;;  %v492_v19 = vld [vmem:[#allocation8 + $0x1d8] sm:$0xff]  ;;  %v487_v20 = vld [vmem:[#allocation8 + $0x1b0] sm:$0xff]  ;;  %v490_v21 = vld [vmem:[#allocation8 + $0x1c8] sm:$0xff] }
  0x6f   :  { %1318 = vmatprep.subr.bf16.mxu0 %v1317_v38  ;;  %1436 = vmatpush3.bf16.msra.mxu1 %v1435_v14  ;;  %v1437_v22 = vpack.c.bf16 %v492_v19, %v489_v17  ;;  %v1343_v23 = vpack.c.bf16 %v490_v21, %v487_v20  ;;  %v441_v24 = vld [vmem:[#allocation8 + $0x40] sm:$0xff]  ;;  %v444_v25 = vld [vmem:[#allocation8 + $0x58] sm:$0xff]  ;;  %v494_v27 = vld [vmem:[#allocation8 + $0x1e8] sm:$0xff] }
  0x70   :  { %v1439_v26 = vpack.c.bf16 %v444_v25, %v441_v24  ;;  %v497_v28 = vld [vmem:[#allocation8 + $0x200] sm:$0xff]  ;;  %v495_v29 = vld [vmem:[#allocation8 + $0x1f0] sm:$0xff]  ;;  %v498_v31 = vld [vmem:[#allocation8 + $0x208] sm:$0xff] }
  0x71   :  { %1438 = vmatprep.subr.bf16.mxu1 %v1437_v22  ;;  %v1345_v30 = vpack.c.bf16 %v497_v28, %v494_v27  ;;  %v493_v32 = vld [vmem:[#allocation8 + $0x1e0] sm:$0xff]  ;;  %v496_v33 = vld [vmem:[#allocation8 + $0x1f8] sm:$0xff]  ;;  %v1441_v34 = vpack.c.bf16 %v498_v31, %v495_v29  ;;  %v447_v36 = vld [vmem:[#allocation8 + $0x70] sm:$0xff] }
  0x72   :  { %1320 = vmatpush1.bf16.msra.mxu0 %v1319_v43  ;;  %v1347_v35 = vpack.c.bf16 %v496_v33, %v493_v32  ;;  %v450_v37 = vld [vmem:[#allocation8 + $0x88] sm:$0xff]  ;;  %v500_v39 = vld [vmem:[#allocation8 + $0x218] sm:$0xff]  ;;  %v503_v40 = vld [vmem:[#allocation8 + $0x230] sm:$0xff] }
  0x73   :  { %1322 = vmatprep.subr.bf16.mxu0 %v1321_v44  ;;  %1440 = vmatpush3.bf16.msra.mxu1 %v1439_v26  ;;  %v1443_v38 = vpack.c.bf16 %v450_v37, %v447_v36  ;;  %v501_v41 = vld [vmem:[#allocation8 + $0x220] sm:$0xff]  ;;  %v1349_v42 = vpack.c.bf16 %v503_v40, %v500_v39  ;;  %v504_v43 = vld [vmem:[#allocation8 + $0x238] sm:$0xff]  ;;  %v499_v44 = vld [vmem:[#allocation8 + $0x210] sm:$0xff] }
  0x74   :  { %1442 = vmatprep.subr.bf16.mxu1 %v1441_v34  ;;  %v502_v45 = vld [vmem:[#allocation8 + $0x228] sm:$0xff]  ;;  %v1445_v46 = vpack.c.bf16 %v504_v43, %v501_v41  ;;  %v453_v48 = vld [vmem:[#allocation8 + $0xa0] sm:$0xff]  ;;  %v456_v49 = vld [vmem:[#allocation8 + $0xb8] sm:$0xff] }
  0x75   :  { %v506_v51 = vld [vmem:[#allocation8 + $0x248] sm:$0xff]  ;;  %v509_v52 = vld [vmem:[#allocation8 + $0x260] sm:$0xff]  ;;  %v508_v57 = vld [vmem:[#allocation8 + $0x258] sm:$0xff] }
  0x76   :  { %1324 = vmatpush1.bf16.msra.mxu0 %v1323_v47  ;;  %v1351_v47 = vpack.c.bf16 %v502_v45, %v499_v44  ;;  %v1353_v54 = vpack.c.bf16 %v509_v52, %v506_v51  ;;  %v510_v55 = vld [vmem:[#allocation8 + $0x268] sm:$0xff]  ;;  %v459_v60 = vld [vmem:[#allocation8 + $0xd0] sm:$0xff]  ;;  %v512_v63 = vld [vmem:[#allocation8 + $0x278] sm:$0xff] }
  0x77   :  { %1326 = vmatprep.subr.bf16.mxu0 %v1325_v50  ;;  %1444 = vmatpush3.bf16.msra.mxu1 %v1443_v38  ;;  %v1447_v50 = vpack.c.bf16 %v456_v49, %v453_v48  ;;  %v462_v61 = vld [vmem:[#allocation8 + $0xe8] sm:$0xff]  ;;  %v515_v1 = vld [vmem:[#allocation8 + $0x290] sm:$0xff]  ;;  %v516_v4 = vld [vmem:[#allocation8 + $0x298] sm:$0xff] }
  0x78   :  { %1446 = vmatprep.subr.bf16.mxu1 %v1445_v46  ;;  %v1357_v3 = vpack.c.bf16 %v515_v1, %v512_v63  ;;  %v511_v5 = vld [vmem:[#allocation8 + $0x270] sm:$0xff]  ;;  %v465_v9 = vld [vmem:[#allocation8 + $0x100] sm:$0xff]  ;;  %v468_v10 = vld [vmem:[#allocation8 + $0x118] sm:$0xff] }
  0x79   :  { %v1455_v12 = vpack.c.bf16 %v468_v10, %v465_v9  ;;  %v521_v13 = vld [vmem:[#allocation8 + $0x2c0] sm:$0xff]  ;;  %v519_v14 = vld [vmem:[#allocation8 + $0x2b0] sm:$0xff]  ;;  %v522_v15 = vld [vmem:[#allocation8 + $0x2c8] sm:$0xff] }
  0x7a   :  { %1328 = vmatpush1.bf16.msra.mxu0 %v1327_v53  ;;  %v507_v53 = vld [vmem:[#allocation8 + $0x250] sm:$0xff]  ;;  %v1457_v17 = vpack.c.bf16 %v522_v15, %v519_v14  ;;  %v520_v19 = vld [vmem:[#allocation8 + $0x2b8] sm:$0xff]  ;;  %v474_v22 = vld [vmem:[#allocation8 + $0x148] sm:$0xff] }
  0x7b   :  { %1330 = vmatprep.subr.bf16.mxu0 %v1329_v56  ;;  %1448 = vmatpush3.bf16.msra.mxu1 %v1447_v50  ;;  %v505_v56 = vld [vmem:[#allocation8 + $0x240] sm:$0xff]  ;;  %v1449_v58 = vpack.c.bf16 %v510_v55, %v507_v53  ;;  %v471_v20 = vld [vmem:[#allocation8 + $0x130] sm:$0xff]  ;;  %v528_v28 = vld [vmem:[#allocation8 + $0x2f8] sm:$0xff] }
  0x7c   :  { %v527_v24 = vld [vmem:[#allocation8 + $0x2f0] sm:$0xff]  ;;  %v1459_v25 = vpack.c.bf16 %v474_v22, %v471_v20  ;;  %v525_v27 = vld [vmem:[#allocation8 + $0x2e0] sm:$0xff]  ;;  %v526_v31 = vld [vmem:[#allocation8 + $0x2e8] sm:$0xff] }
  0x7d   :  { %1450 = vmatprep.subr.bf16.mxu1 %v1449_v58  ;;  %v523_v29 = vld [vmem:[#allocation8 + $0x2d0] sm:$0xff]  ;;  %v477_v32 = vld [vmem:[#allocation8 + $0x160] sm:$0xff]  ;;  %v480_v33 = vld [vmem:[#allocation8 + $0x178] sm:$0xff] }
  0x7e   :  { %1332 = vmatpush1.bf16.msra.mxu0 %v1331_v59  ;;  %v1355_v59 = vpack.c.bf16 %v508_v57, %v505_v56  ;;  %v1367_v34 = vpack.c.bf16 %v526_v31, %v523_v29  ;;  %v530_v36 = vld [vmem:[#allocation8 + $0x308] sm:$0xff]  ;;  %v533_v37 = vld [vmem:[#allocation8 + $0x320] sm:$0xff]  ;;  %v579_v38 = vld [vmem:[#allocation8 + $0x490] sm:$0xff] }
  0x7f   :  { %1334 = vmatprep.subr.bf16.mxu0 %v1333_v62  ;;  %v1451_v62 = vpack.c.bf16 %v462_v61, %v459_v60  ;;  %v1369_v39 = vpack.c.bf16 %v533_v37, %v530_v36  ;;  %v582_v40 = vld [vmem:[#allocation8 + $0x4a8] sm:$0xff]  ;;  %v89_v45 = vld [vmem:[#allocation7] ss:$4 sm:$0xf] }
  0x80   :  { %v1465_v41 = vpack.c.bf16 %v582_v40, %v579_v38 }
  0x81   :  { %1452 = vmatpush3.bf16.msra.mxu1 %v1451_v62 }
  0x82   :  { %1336 = vmatpush1.bf16.msra.mxu0 %v1335_v2  ;;  %v513_v2 = vld [vmem:[#allocation8 + $0x280] sm:$0xff] }
  0x83   :  { %1338 = vmatprep.subr.bf16.mxu0 %v1337_v6  ;;  %v514_v6 = vld [vmem:[#allocation8 + $0x288] sm:$0xff]  ;;  %v1453_v7 = vpack.c.bf16 %v516_v4, %v513_v2 }
  0x84   :  { %v1359_v8 = vpack.c.bf16 %v514_v6, %v511_v5 }
  0x85   :  { %1454 = vmatprep.subr.bf16.mxu1 %v1453_v7 }
  0x86   :  { %1340 = vmatpush1.bf16.msra.mxu0 %v1339_v11  ;;  %v518_v11 = vld [vmem:[#allocation8 + $0x2a8] sm:$0xff]  ;;  %1456 = vmatpush3.bf16.msra.mxu1 %v1455_v12 }
  0x87   :  { %1342 = vmatprep.subr.bf16.mxu0 %v1341_v18  ;;  %v1361_v16 = vpack.c.bf16 %v521_v13, %v518_v11  ;;  %v517_v18 = vld [vmem:[#allocation8 + $0x2a0] sm:$0xff]  ;;  %1458 = vmatprep.subr.bf16.mxu1 %v1457_v17 }
  0x88   :  { %v1363_v21 = vpack.c.bf16 %v520_v19, %v517_v18 }
  0x8a   :  { %1344 = vmatpush1.bf16.msra.mxu0 %v1343_v23  ;;  %v524_v23 = vld [vmem:[#allocation8 + $0x2d8] sm:$0xff]  ;;  %1460 = vmatpush3.bf16.msra.mxu1 %v1459_v25 }
  0x8b   :  { %1346 = vmatprep.subr.bf16.mxu0 %v1345_v30  ;;  %v1365_v26 = vpack.c.bf16 %v527_v24, %v524_v23  ;;  %v1461_v30 = vpack.c.bf16 %v528_v28, %v525_v27 }
  0x8d   :  { %1462 = vmatprep.subr.bf16.mxu1 %v1461_v30 }
  0x8e   :  { %1348 = vmatpush1.bf16.msra.mxu0 %v1347_v35  ;;  %v1463_v35 = vpack.c.bf16 %v480_v33, %v477_v32 }
  0x8f   :  { %1350 = vmatprep.subr.bf16.mxu0 %v1349_v42  ;;  %v109_v42 = vlaneseq }
  0x90   :  { %1464 = vmatpush3.bf16.msra.mxu1 %v1463_v35 }
  0x91   :  { %1466 = vmatprep.subr.bf16.mxu1 %v1465_v41  ;;  %v110_v43 = vshrl.u32 %v109_v42, 7 }
  0x92   :  { %1352 = vmatpush1.bf16.msra.mxu0 %v1351_v47 }
  0x93   :  { %1354 = vmatprep.subr.bf16.mxu0 %v1353_v54  ;;  %v1836_v44 = vsub.s32 0, %v110_v43  ;;  %v1838_v46 = vsub.s32 1, %v110_v43  ;;  %v1840_v47 = vsub.s32 2, %v110_v43  ;;  %v1842_v48 = vsub.s32 3, %v110_v43 }
  0x95   :  { %v112_v49 = vrot.slane %v89_v45, %v1836_v44  ;;  %v116_v50 = vrot.slane %v89_v45, %v1838_v46  ;;  %v120_v51 = vrot.slane %v89_v45, %v1840_v47  ;;  %v124_v53 = vrot.slane %v89_v45, %v1842_v48 }
  0x96   :  { %1356 = vmatpush1.bf16.msra.mxu0 %v1355_v59 }
  0x97   :  { %1358 = vmatprep.subr.bf16.mxu0 %v1357_v3 }
  0x9a   :  { %1360 = vmatpush1.bf16.msra.mxu0 %v1359_v8 }
  0x9b   :  { %1362 = vmatprep.subr.bf16.mxu0 %v1361_v16 }
  0x9e   :  { %1364 = vmatpush1.bf16.msra.mxu0 %v1363_v21 }
  0x9f   :  { %1366 = vmatprep.subr.bf16.mxu0 %v1365_v26 }
  0xa2   :  { %1368 = vmatpush1.bf16.msra.mxu0 %v1367_v34 }
  0xa3   :  { %1370 = vmatprep.subr.bf16.mxu0 %v1369_v39 }
 0x138   :  { %v199_v52 = vpop.f32.mrb[0].mxu0 }
 0x139   :  { %v200_v54 = vadd.f32 %v199_v52, %v112_v49  ;;  %v201_v55 = vpop.f32.mrb[1].mxu0 }
 0x13a   :  { %v202_v56 = vadd.f32 %v201_v55, %v116_v50  ;;  %v270_v57 = vpop.f32.mrb[0].mxu1 }
 0x13b   :  { %v1848_v58 = vmax.f32 %v200_v54, 0.0  ;;  %v271_v59 = vadd.f32 %v270_v57, %v120_v51  ;;  %v272_v60 = vpop.f32.mrb[1].mxu1 }
 0x13c   :  { %v1850_v61 = vmax.f32 %v202_v56, 0.0  ;;  %v273_v62 = vadd.f32 %v272_v60, %v124_v53 }
 0x13d   :  { %v279_v63 = vrot.slane %v1848_v58, 4  ;;  %v303_v1 = vmul.f32 %v1848_v58, %v1848_v58  ;;  %v1855_v2 = vmax.f32 %v271_v59, 0.0 }
 0x13e   :  { %v285_v3 = vrot.slane %v1850_v61, 4  ;;  %v304_v4 = vmul.f32 %v1850_v61, %v1850_v61  ;;  %v1860_v5 = vmax.f32 %v273_v62, 0.0 }
 0x13f   :  { %v280_v6 = vadd.f32 %v279_v63, %v1848_v58  ;;  %v307_v7 = vrot.slane %v303_v1, 4  ;;  %v291_v14 = vrot.slane %v1855_v2, 4  ;;  %v305_v15 = vmul.f32 %v1855_v2, %v1855_v2 }
 0x140   :  { %v286_v8 = vadd.f32 %v285_v3, %v1850_v61  ;;  %v313_v9 = vrot.slane %v304_v4, 4  ;;  %v297_v10 = vrot.slane %v1860_v5, 4  ;;  %v306_v11 = vmul.f32 %v1860_v5, %v1860_v5 }
 0x141   :  { %v281_v12 = vrot.slane %v280_v6, 2  ;;  %v308_v13 = vadd.f32 %v307_v7, %v303_v1  ;;  %v292_v28 = vadd.f32 %v291_v14, %v1855_v2  ;;  %v319_v29 = vrot.slane %v305_v15, 4 }
 0x142   :  { %v287_v16 = vrot.slane %v286_v8, 2  ;;  %v314_v17 = vadd.f32 %v313_v9, %v304_v4  ;;  %v298_v18 = vadd.f32 %v297_v10, %v1860_v5  ;;  %v325_v19 = vrot.slane %v306_v11, 4 }
 0x143   :  { %v282_v20 = vadd.f32 %v281_v12, %v280_v6  ;;  %v309_v21 = vrot.slane %v308_v13, 2  ;;  %v293_v42 = vrot.slane %v292_v28, 2  ;;  %v320_v43 = vadd.f32 %v319_v29, %v305_v15 }
 0x144   :  { %v288_v22 = vadd.f32 %v287_v16, %v286_v8  ;;  %v315_v23 = vrot.slane %v314_v17, 2  ;;  %v299_v24 = vrot.slane %v298_v18, 2  ;;  %v326_v25 = vadd.f32 %v325_v19, %v306_v11  ;;  %v1876_v16 = vld [vmem:[#allocation7 + $0x1] ss:$4 sm:$0xf] }
 0x145   :  { %v283_v26 = vrot.slane %v282_v20, 1  ;;  %v310_v27 = vadd.f32 %v309_v21, %v308_v13  ;;  %v294_v59 = vadd.f32 %v293_v42, %v292_v28  ;;  %v321_v60 = vrot.slane %v320_v43, 2  ;;  %v534_v42 = vld [vmem:[#allocation8 + $0x328] sm:$0xff] }
 0x146   :  { %v316_v30 = vadd.f32 %v315_v23, %v314_v17  ;;  %v300_v31 = vadd.f32 %v299_v24, %v298_v18  ;;  %v327_v32 = vrot.slane %v326_v25, 2  ;;  %v289_v33 = vrot.slane %v288_v22, 1 }
 0x147   :  { %v284_v34 = vadd.f32 %v283_v26, %v282_v20  ;;  %v311_v35 = vrot.slane %v310_v27, 1  ;;  %v295_v8 = vrot.slane %v294_v59, 1  ;;  %v322_v9 = vadd.f32 %v321_v60, %v320_v43  ;;  %v1888_v26 = vld [vmem:[#allocation7 + $0x2] ss:$4 sm:$0xf] }
 0x148   :  { %v317_v36 = vrot.slane %v316_v30, 1  ;;  %v328_v37 = vadd.f32 %v327_v32, %v326_v25  ;;  %v290_v38 = vadd.f32 %v289_v33, %v288_v22  ;;  %v301_v39 = vrot.slane %v300_v31, 1 }
 0x149   :  { %v312_v40 = vadd.f32 %v311_v35, %v310_v27  ;;  %v331_v41 = vmul.f32 0.125, %v284_v34  ;;  %v296_v13 = vadd.f32 %v295_v8, %v294_v59  ;;  %v323_v14 = vrot.slane %v322_v9, 1  ;;  %v538_v59 = vld [vmem:[#allocation8 + $0x348] sm:$0xff] }
 0x14a   :  { %v318_v45 = vadd.f32 %v317_v36, %v316_v30  ;;  %v329_v49 = vrot.slane %v328_v37, 1  ;;  %v332_v50 = vmul.f32 0.125, %v290_v38  ;;  %v302_v51 = vadd.f32 %v301_v39, %v300_v31  ;;  %v529_v36 = vld [vmem:[#allocation8 + $0x300] sm:$0xff]  ;;  %v594_v8 = vld [vmem:[#allocation8 + $0x508] sm:$0xff] }
 0x14b   :  { %v335_v52 = vmul.f32 0.125, %v312_v40  ;;  %v339_v53 = vmul.f32 %v331_v41, %v331_v41  ;;  %v324_v17 = vadd.f32 %v323_v14, %v322_v9  ;;  %v1878_v18 = vmul.f32 0.125, %v296_v13  ;;  %v531_v40 = vld [vmem:[#allocation8 + $0x310] sm:$0xff]  ;;  %v544_v13 = vld [vmem:[#allocation8 + $0x378] sm:$0xff] }
 0x14c   :  { %v336_v54 = vmul.f32 0.125, %v318_v45  ;;  %v330_v55 = vadd.f32 %v329_v49, %v328_v37  ;;  %v340_v56 = vmul.f32 %v332_v50, %v332_v50  ;;  %v1872_v62 = vmul.f32 0.125, %v302_v51  ;;  %v532_v37 = vld [vmem:[#allocation8 + $0x318] sm:$0xff]  ;;  %v585_v49 = vld [vmem:[#allocation8 + $0x4c0] sm:$0xff] }
 0x14d   :  { %v343_v57 = vsub.f32 %v335_v52, %v339_v53  ;;  %v363_v19 = vrot.slane %v1876_v16, %v1836_v44  ;;  %v367_v20 = vrot.slane %v1876_v16, %v1838_v46  ;;  %v337_v22 = vmul.f32 0.125, %v324_v17  ;;  %v543_v17 = vld [vmem:[#allocation8 + $0x370] sm:$0xff] }
 0x14e   :  { %v338_v63 = vmul.f32 0.125, %v330_v55  ;;  %v344_v1 = vsub.f32 %v336_v54, %v340_v56  ;;  %v342_v4 = vmul.f32 %v1872_v62, %v1872_v62  ;;  %v341_v23 = vmul.f32 %v1878_v18, %v1878_v18 }
 0x14f   :  { %v347_v3 = vmax.f32 %v343_v57, 0.0  ;;  %v375_v25 = vrot.slane %v1876_v16, %v1842_v48  ;;  %v384_v29 = vsub.f32 %v1848_v58, %v331_v41  ;;  %v385_v33 = vsub.f32 %v1850_v61, %v332_v50  ;;  %v536_v58 = vld [vmem:[#allocation8 + $0x338] sm:$0xff]  ;;  %v539_v61 = vld [vmem:[#allocation8 + $0x350] sm:$0xff] }
 0x150   :  { %v348_v6 = vmax.f32 %v344_v1, 0.0  ;;  %v346_v10 = vsub.f32 %v338_v63, %v342_v4  ;;  %v345_v32 = vsub.f32 %v337_v22, %v341_v23  ;;  %v416_v35 = vrot.slane %v1888_v26, %v1838_v46  ;;  %v588_v50 = vld [vmem:[#allocation8 + $0x4d8] sm:$0xff]  ;;  %v535_v57 = vld [vmem:[#allocation8 + $0x330] sm:$0xff]  ;;  %v597_v22 = vld [vmem:[#allocation8 + $0x520] sm:$0xff] }
 0x151   :  { %v351_v7 = vadd.f32 1e-05, %v347_v3  ;;  %v412_v39 = vrot.slane %v1888_v26, %v1836_v44  ;;  %v387_v43 = vsub.f32 %v1860_v5, %v1872_v62  ;;  %v424_v52 = vrot.slane %v1888_v26, %v1842_v48  ;;  %v537_v3 = vld [vmem:[#allocation8 + $0x340] sm:$0xff]  ;;  %v540_v5 = vld [vmem:[#allocation8 + $0x358] sm:$0xff]  ;;  %v542_v62 = vld [vmem:[#allocation8 + $0x368] sm:$0xff] }
 0x152   :  { %v352_v11 = vadd.f32 1e-05, %v348_v6  ;;  %v350_v12 = vmax.f32 %v346_v10, 0.0  ;;  %v349_v53 = vmax.f32 %v345_v32, 0.0  ;;  %v1371_v55 = vpack.c.bf16 %v532_v37, %v529_v36  ;;  %v545_v6 = vld [vmem:[#allocation8 + $0x380] sm:$0xff]  ;;  %v600_v23 = vld [vmem:[#allocation8 + $0x538] sm:$0xff] }
 0x153   :  { %1572 = vrsqrt.f32 %v351_v7  ;;  %v1467_v56 = vpack.c.bf16 %v534_v42, %v531_v40  ;;  %v1373_v63 = vpack.c.bf16 %v539_v61, %v536_v58  ;;  %v1469_v1 = vpack.c.bf16 %v588_v50, %v585_v49  ;;  %v591_v7 = vld [vmem:[#allocation8 + $0x4f0] sm:$0xff]  ;;  %v552_v32 = vld [vmem:[#allocation8 + $0x3b8] sm:$0xff]  ;;  %v606_v36 = vld [vmem:[#allocation8 + $0x568] sm:$0xff] }
 0x154   :  { %1574 = vrsqrt.f32 %v352_v11  ;;  %v354_v15 = vadd.f32 1e-05, %v350_v12  ;;  %v353_v9 = vadd.f32 1e-05, %v349_v53  ;;  %v1375_v10 = vpack.c.bf16 %v538_v59, %v535_v57  ;;  %v541_v12 = vld [vmem:[#allocation8 + $0x360] sm:$0xff]  ;;  %v556_v40 = vld [vmem:[#allocation8 + $0x3d8] sm:$0xff] }
 0x155   :  { %v1471_v11 = vpack.c.bf16 %v540_v5, %v537_v3  ;;  %v1377_v14 = vpack.c.bf16 %v545_v6, %v542_v62  ;;  %v563_v61 = vld [vmem:[#allocation8 + $0x410] sm:$0xff]  ;;  %v609_v49 = vld [vmem:[#allocation8 + $0x580] sm:$0xff]  ;;  %v612_v50 = vld [vmem:[#allocation8 + $0x598] sm:$0xff] }
 0x156   :  { %1576 = vrsqrt.f32 %v354_v15  ;;  %v1473_v15 = vpack.c.bf16 %v594_v8, %v591_v7  ;;  %v559_v53 = vld [vmem:[#allocation8 + $0x3f0] sm:$0xff]  ;;  %v561_v57 = vld [vmem:[#allocation8 + $0x400] sm:$0xff]  ;;  %v564_v59 = vld [vmem:[#allocation8 + $0x418] sm:$0xff] }
 0x157   :  { %1578 = vrsqrt.f32 %v353_v9  ;;  %v569_v3 = vld [vmem:[#allocation8 + $0x440] sm:$0xff]  ;;  %v615_v5 = vld [vmem:[#allocation8 + $0x5b0] sm:$0xff]  ;;  %v618_v62 = vld [vmem:[#allocation8 + $0x5c8] sm:$0xff]  ;;  %v1487_v6 = vpack.c.bf16 %v564_v59, %v561_v57 }
 0x158   :  { %v565_v7 = vld [vmem:[#allocation8 + $0x420] sm:$0xff]  ;;  %v568_v8 = vld [vmem:[#allocation8 + $0x438] sm:$0xff] }
 0x159   :  { %v605_v57 = vld [vmem:[#allocation8 + $0x560] sm:$0xff] }
 0x15d   :  { %v1573_v21 = vpop.eup %1572 }
 0x15e   :  { %v1575_v24 = vpop.eup %1574  ;;  %v380_v27 = vmul.f32 %v1573_v21, %v363_v19  ;;  %v546_v19 = vld [vmem:[#allocation8 + $0x388] sm:$0xff]  ;;  %v551_v21 = vld [vmem:[#allocation8 + $0x3b0] sm:$0xff] }
 0x15f   :  { %v381_v28 = vmul.f32 %v1575_v24, %v367_v20  ;;  %v548_v20 = vld [vmem:[#allocation8 + $0x398] sm:$0xff]  ;;  %v1379_v24 = vpack.c.bf16 %v544_v13, %v541_v12  ;;  %v575_v13 = vld [vmem:[#allocation8 + $0x470] sm:$0xff] }
 0x160   :  { %v391_v30 = vrot.slane %v380_v27, %v1836_v44  ;;  %v1577_v31 = vpop.eup %1576  ;;  %v547_v27 = vld [vmem:[#allocation8 + $0x390] sm:$0xff]  ;;  %v572_v12 = vld [vmem:[#allocation8 + $0x458] sm:$0xff] }
 0x161   :  { %v395_v34 = vrot.slane %v381_v28, %v1836_v44  ;;  %v383_v41 = vmul.f32 %v1577_v31, %v375_v25  ;;  %v1475_v25 = vpack.c.bf16 %v546_v19, %v543_v17  ;;  %v550_v28 = vld [vmem:[#allocation8 + $0x3a8] sm:$0xff]  ;;  %v549_v31 = vld [vmem:[#allocation8 + $0x3a0] sm:$0xff]  ;;  %v1395_v17 = vpack.c.bf16 %v568_v8, %v565_v7 }
 0x162   :  { %v404_v38 = vmul.f32 %v391_v30, %v384_v29  ;;  %v1381_v29 = vpack.c.bf16 %v551_v21, %v548_v20  ;;  %v1477_v30 = vpack.c.bf16 %v600_v23, %v597_v22  ;;  %v1383_v37 = vpack.c.bf16 %v550_v28, %v547_v27  ;;  %v571_v21 = vld [vmem:[#allocation8 + $0x450] sm:$0xff]  ;;  %v576_v27 = vld [vmem:[#allocation8 + $0x478] sm:$0xff]  ;;  %v610_v7 = vld [vmem:[#allocation8 + $0x588] sm:$0xff] }
 0x163   :  { %v405_v45 = vmul.f32 %v395_v34, %v385_v33  ;;  %v403_v51 = vrot.slane %v383_v41, %v1836_v44  ;;  %v554_v33 = vld [vmem:[#allocation8 + $0x3c8] sm:$0xff]  ;;  %v557_v34 = vld [vmem:[#allocation8 + $0x3e0] sm:$0xff]  ;;  %v555_v41 = vld [vmem:[#allocation8 + $0x3d0] sm:$0xff]  ;;  %v1397_v20 = vpack.c.bf16 %v575_v13, %v572_v12  ;;  %v386_v22 = vsub.f32 %v1855_v2, %v1878_v18 }
 0x164   :  { %v429_v60 = vadd.f32 %v412_v39, %v404_v38  ;;  %v1479_v38 = vpack.c.bf16 %v552_v32, %v549_v31  ;;  %v553_v39 = vld [vmem:[#allocation8 + $0x3c0] sm:$0xff]  ;;  %v1385_v42 = vpack.c.bf16 %v557_v34, %v554_v33  ;;  %v420_v2 = vrot.slane %v1888_v26, %v1840_v47  ;;  %v614_v8 = vld [vmem:[#allocation8 + $0x5a8] sm:$0xff]  ;;  %v616_v12 = vld [vmem:[#allocation8 + $0x5b8] sm:$0xff] }
 0x165   :  { %v430_v54 = vadd.f32 %v416_v35, %v405_v45  ;;  %v407_v4 = vmul.f32 %v403_v51, %v387_v43  ;;  %v603_v35 = vld [vmem:[#allocation8 + $0x550] sm:$0xff]  ;;  %v558_v43 = vld [vmem:[#allocation8 + $0x3e8] sm:$0xff]  ;;  %v560_v45 = vld [vmem:[#allocation8 + $0x3f8] sm:$0xff]  ;;  %v1387_v51 = vpack.c.bf16 %v556_v40, %v553_v39 }
 0x166   :  { %v1481_v58 = vpack.c.bf16 %v606_v36, %v603_v35  ;;  %v577_v18 = vld [vmem:[#allocation8 + $0x480] sm:$0xff]  ;;  %v580_v35 = vld [vmem:[#allocation8 + $0x498] sm:$0xff] }
 0x167   :  { %705 = vmatprep.mubr.f32.mxu0 %v430_v54  ;;  %847 = vmatprep.mubr.f32.mxu1 %v430_v54  ;;  %v432_v48 = vadd.f32 %v424_v52, %v407_v4  ;;  %v1483_v52 = vpack.c.bf16 %v558_v43, %v555_v41  ;;  %v562_v54 = vld [vmem:[#allocation8 + $0x408] sm:$0xff]  ;;  %v584_v36 = vld [vmem:[#allocation8 + $0x4b8] sm:$0xff]  ;;  %v593_v43 = vld [vmem:[#allocation8 + $0x500] sm:$0xff] }
 0x168   :  { %706 = vmatmul.mubr.f32.vlgmr.msra.gmra.mrb[2].mxu0 %v429_v60  ;;  %848 = vmatmul.mubr.f32.vlgmr.msra.gmra.mrb[2].mxu1 %v429_v60  ;;  %v566_v60 = vld [vmem:[#allocation8 + $0x428] sm:$0xff]  ;;  %v1391_v4 = vpack.c.bf16 %v562_v54, %v559_v53  ;;  %v589_v26 = vld [vmem:[#allocation8 + $0x4e0] sm:$0xff]  ;;  %v595_v54 = vld [vmem:[#allocation8 + $0x510] sm:$0xff] }
 0x169   :  { %1372 = vmatpush1.bf16.msra.mxu0 %v1371_v55  ;;  %1468 = vmatpush3.bf16.msra.mxu1 %v1467_v56  ;;  %v1389_v55 = vpack.c.bf16 %v563_v61, %v560_v45  ;;  %v1485_v56 = vpack.c.bf16 %v612_v50, %v609_v49  ;;  %v1393_v9 = vpack.c.bf16 %v569_v3, %v566_v60  ;;  %v590_v41 = vld [vmem:[#allocation8 + $0x4e8] sm:$0xff]  ;;  %v592_v49 = vld [vmem:[#allocation8 + $0x4f8] sm:$0xff] }
 0x16a   :  { %1374 = vmatprep.subr.bf16.mxu0 %v1373_v63  ;;  %1470 = vmatprep.subr.bf16.mxu1 %v1469_v1  ;;  %v371_v63 = vrot.slane %v1876_v16, %v1840_v47  ;;  %v1579_v1 = vpop.eup %1578  ;;  %v621_v16 = vld [vmem:[#allocation8 + $0x5e0] sm:$0xff]  ;;  %v1409_v61 = vpack.c.bf16 %v593_v43, %v590_v41  ;;  %v596_v50 = vld [vmem:[#allocation8 + $0x518] sm:$0xff]  ;;  %v951_v43 = vld [vmem:[#allocation10 + $0xc8] sm:$0xff] }
 0x16b   :  { %776 = vmatprep.mubr.f32.mxu0 %v432_v48  ;;  %917 = vmatprep.mubr.f32.mxu1 %v432_v48  ;;  %v567_v48 = vld [vmem:[#allocation8 + $0x430] sm:$0xff]  ;;  %v608_v3 = vld [vmem:[#allocation8 + $0x578] sm:$0xff]  ;;  %v950_v41 = vld [vmem:[#allocation10 + $0xc0] sm:$0xff] }
 0x16c   :  { %v620_v13 = vld [vmem:[#allocation8 + $0x5d8] sm:$0xff] }
 0x16d   :  { %1376 = vmatpush1.bf16.msra.mxu0 %v1375_v10  ;;  %1472 = vmatpush3.bf16.msra.mxu1 %v1471_v11  ;;  %v1489_v10 = vpack.c.bf16 %v618_v62, %v615_v5  ;;  %v570_v11 = vld [vmem:[#allocation8 + $0x448] sm:$0xff]  ;;  %v611_v5 = vld [vmem:[#allocation8 + $0x590] sm:$0xff] }
 0x16e   :  { %1378 = vmatprep.subr.bf16.mxu0 %v1377_v14  ;;  %1474 = vmatprep.subr.bf16.mxu1 %v1473_v15  ;;  %v382_v14 = vmul.f32 %v1579_v1, %v371_v63  ;;  %v624_v15 = vld [vmem:[#allocation8 + $0x5f8] sm:$0xff]  ;;  %v1491_v19 = vpack.c.bf16 %v570_v11, %v567_v48  ;;  %v601_v63 = vld [vmem:[#allocation8 + $0x540] sm:$0xff] }
 0x16f   :  { %v1493_v23 = vpack.c.bf16 %v624_v15, %v621_v16  ;;  %v604_v1 = vld [vmem:[#allocation8 + $0x558] sm:$0xff]  ;;  %v617_v48 = vld [vmem:[#allocation8 + $0x5c0] sm:$0xff] }
 0x170   :  { %v399_v28 = vrot.slane %v382_v14, %v1836_v44  ;;  %v1419_v62 = vpack.c.bf16 %v604_v1, %v601_v63  ;;  %v613_v11 = vld [vmem:[#allocation8 + $0x5a0] sm:$0xff]  ;;  %v623_v14 = vld [vmem:[#allocation8 + $0x5f0] sm:$0xff]  ;;  %v939_v1 = vld [vmem:[#allocation10 + $0x68] sm:$0xff] }
 0x171   :  { %1380 = vmatpush1.bf16.msra.mxu0 %v1379_v24  ;;  %1476 = vmatpush3.bf16.msra.mxu1 %v1475_v25  ;;  %v574_v24 = vld [vmem:[#allocation8 + $0x468] sm:$0xff]  ;;  %v573_v25 = vld [vmem:[#allocation8 + $0x460] sm:$0xff]  ;;  %v1427_v16 = vpack.c.bf16 %v616_v12, %v613_v11  ;;  %v1429_v15 = vpack.c.bf16 %v623_v14, %v620_v13 }
 0x172   :  { %1382 = vmatprep.subr.bf16.mxu0 %v1381_v29  ;;  %1478 = vmatprep.subr.bf16.mxu1 %v1477_v30  ;;  %v578_v29 = vld [vmem:[#allocation8 + $0x488] sm:$0xff]  ;;  %v581_v30 = vld [vmem:[#allocation8 + $0x4a0] sm:$0xff]  ;;  %v1399_v31 = vpack.c.bf16 %v574_v24, %v571_v21  ;;  %v1495_v32 = vpack.c.bf16 %v576_v27, %v573_v25  ;;  %v406_v34 = vmul.f32 %v399_v28, %v386_v22  ;;  %v944_v28 = vld [vmem:[#allocation10 + $0x90] sm:$0xff] }
 0x173   :  { %v1401_v33 = vpack.c.bf16 %v581_v30, %v578_v29  ;;  %v942_v21 = vld [vmem:[#allocation10 + $0x80] sm:$0xff]  ;;  %v943_v22 = vld [vmem:[#allocation10 + $0x88] sm:$0xff]  ;;  %v945_v29 = vld [vmem:[#allocation10 + $0x98] sm:$0xff] }
 0x174   :  { %v431_v39 = vadd.f32 %v420_v2, %v406_v34  ;;  %v926_v24 = vld [vmem:[#allocation10] sm:$0xff]  ;;  %v927_v25 = vld [vmem:[#allocation10 + $0x8] sm:$0xff]  ;;  %v928_v30 = vld [vmem:[#allocation10 + $0x10] sm:$0xff] }
 0x175   :  { %1384 = vmatpush1.bf16.msra.mxu0 %v1383_v37  ;;  %1480 = vmatpush3.bf16.msra.mxu1 %v1479_v38  ;;  %v587_v37 = vld [vmem:[#allocation8 + $0x4d0] sm:$0xff]  ;;  %v1403_v38 = vpack.c.bf16 %v580_v35, %v577_v18  ;;  %v1499_v27 = vpack.c.bf16 %v927_v25, %v926_v24  ;;  %v947_v34 = vld [vmem:[#allocation10 + $0xa8] sm:$0xff]  ;;  %v930_v35 = vld [vmem:[#allocation10 + $0x20] sm:$0xff] }
 0x176   :  { %1386 = vmatprep.subr.bf16.mxu0 %v1385_v42  ;;  %1482 = vmatprep.subr.bf16.mxu1 %v1481_v58  ;;  %v1405_v40 = vpack.c.bf16 %v587_v37, %v584_v36  ;;  %v583_v42 = vld [vmem:[#allocation8 + $0x4b0] sm:$0xff]  ;;  %v586_v58 = vld [vmem:[#allocation8 + $0x4c8] sm:$0xff]  ;;  %v938_v63 = vld [vmem:[#allocation10 + $0x60] sm:$0xff] }
 0x177   :  { %v1407_v45 = vpack.c.bf16 %v586_v58, %v583_v42  ;;  %v931_v36 = vld [vmem:[#allocation10 + $0x28] sm:$0xff]  ;;  %v948_v37 = vld [vmem:[#allocation10 + $0xb0] sm:$0xff]  ;;  %v933_v58 = vld [vmem:[#allocation10 + $0x38] sm:$0xff] }
 0x178   :  { %v932_v42 = vld [vmem:[#allocation10 + $0x30] sm:$0xff]  ;;  %v94_v12 = vld [vmem:[%s1936_s4] ss:$2 sm:$0x7]  ;;  %v958_v25 = vld [vmem:[#allocation10 + $0x100] sm:$0xff] }
 0x179   :  { %1388 = vmatpush1.bf16.msra.mxu0 %v1387_v51  ;;  %1484 = vmatpush3.bf16.msra.mxu1 %v1483_v52  ;;  %v599_v51 = vld [vmem:[#allocation8 + $0x530] sm:$0xff]  ;;  %v1411_v52 = vpack.c.bf16 %v592_v49, %v589_v26  ;;  %v934_v26 = vld [vmem:[#allocation10 + $0x40] sm:$0xff]  ;;  %v935_v49 = vld [vmem:[#allocation10 + $0x48] sm:$0xff]  ;;  %v637_v13 = vrot.slane %v94_v12, %v1840_v47 }
 0x17a   :  { %1390 = vmatprep.subr.bf16.mxu0 %v1389_v55  ;;  %1486 = vmatprep.subr.bf16.mxu1 %v1485_v56  ;;  %v1413_v53 = vpack.c.bf16 %v599_v51, %v596_v50  ;;  %v598_v55 = vld [vmem:[#allocation8 + $0x528] sm:$0xff]  ;;  %v952_v50 = vld [vmem:[#allocation10 + $0xd0] sm:$0xff]  ;;  %v953_v51 = vld [vmem:[#allocation10 + $0xd8] sm:$0xff] }
 0x17b   :  { %v602_v56 = vld [vmem:[#allocation8 + $0x548] sm:$0xff]  ;;  %v1415_v59 = vpack.c.bf16 %v598_v55, %v595_v54  ;;  %v936_v54 = vld [vmem:[#allocation10 + $0x50] sm:$0xff]  ;;  %v937_v55 = vld [vmem:[#allocation10 + $0x58] sm:$0xff] }
 0x17c   :  { %v1417_v60 = vpack.c.bf16 %v605_v57, %v602_v56  ;;  %v954_v56 = vld [vmem:[#allocation10 + $0xe0] sm:$0xff]  ;;  %v955_v57 = vld [vmem:[#allocation10 + $0xe8] sm:$0xff]  ;;  %v961_v47 = vld [vmem:[#allocation10 + $0x118] sm:$0xff] }
 0x17d   :  { %1392 = vmatpush1.bf16.msra.mxu0 %v1391_v4  ;;  %1488 = vmatpush3.bf16.msra.mxu1 %v1487_v6  ;;  %v1421_v4 = vpack.c.bf16 %v611_v5, %v608_v3  ;;  %v607_v6 = vld [vmem:[#allocation8 + $0x570] sm:$0xff]  ;;  %v1523_v3 = vpack.c.bf16 %v939_v1, %v938_v63 }
 0x17e   :  { %1394 = vmatprep.subr.bf16.mxu0 %v1393_v9  ;;  %1490 = vmatprep.subr.bf16.mxu1 %v1489_v10  ;;  %v1423_v9 = vpack.c.bf16 %v610_v7, %v607_v6  ;;  %v1425_v10 = vpack.c.bf16 %v617_v48, %v614_v8  ;;  %v956_v5 = vld [vmem:[#allocation10 + $0xf0] sm:$0xff]  ;;  %v941_v7 = vld [vmem:[#allocation10 + $0x78] sm:$0xff]  ;;  %v1734_v48 = vmov 0.0|0.0  }
 0x17f   :  { %v940_v6 = vld [vmem:[#allocation10 + $0x70] sm:$0xff] }
 0x180   :  { %v1527_v8 = vpack.c.bf16 %v941_v7, %v940_v6 }
 0x181   :  { %1396 = vmatpush1.bf16.msra.mxu0 %v1395_v17  ;;  %1492 = vmatpush3.bf16.msra.mxu1 %v1491_v19  ;;  %v619_v17 = vld [vmem:[#allocation8 + $0x5d0] sm:$0xff]  ;;  %v622_v19 = vld [vmem:[#allocation8 + $0x5e8] sm:$0xff] }
 0x182   :  { %1398 = vmatprep.subr.bf16.mxu0 %v1397_v20  ;;  %1494 = vmatprep.subr.bf16.mxu1 %v1493_v23  ;;  %v1431_v20 = vpack.c.bf16 %v622_v19, %v619_v17  ;;  %v1497_v23 = vpack.c.bf16 %v943_v22, %v942_v21  ;;  %v633_v21 = vrot.slane %v94_v12, %v1838_v46  ;;  %v963_v46 = vld [vmem:[#allocation10 + $0x128] sm:$0xff] }
 0x185   :  { %1400 = vmatpush1.bf16.msra.mxu0 %v1399_v31  ;;  %1496 = vmatpush3.bf16.msra.mxu1 %v1495_v32  ;;  %v1501_v31 = vpack.c.bf16 %v945_v29, %v944_v28  ;;  %v929_v32 = vld [vmem:[#allocation10 + $0x18] sm:$0xff] }
 0x186   :  { %1402 = vmatprep.subr.bf16.mxu0 %v1401_v33  ;;  %1498 = vmatprep.subr.bf16.mxu1 %v1497_v23  ;;  %v946_v33 = vld [vmem:[#allocation10 + $0xa0] sm:$0xff]  ;;  %v1503_v2 = vpack.c.bf16 %v929_v32, %v928_v30  ;;  %v960_v32 = vld [vmem:[#allocation10 + $0x110] sm:$0xff] }
 0x187   :  { %v1505_v18 = vpack.c.bf16 %v947_v34, %v946_v33  ;;  %v1533_v33 = vpack.c.bf16 %v961_v47, %v960_v32 }
 0x188   :  { %918 = vmatmul.mubr.f32.vlgmr.msra.gmra.mrb[4].mxu1 %v431_v39 }
 0x189   :  { %1404 = vmatpush1.bf16.msra.mxu0 %v1403_v38  ;;  %1500 = vmatpush3.bf16.msra.mxu1 %v1499_v27  ;;  %v949_v38 = vld [vmem:[#allocation10 + $0xb8] sm:$0xff]  ;;  %v959_v27 = vld [vmem:[#allocation10 + $0x108] sm:$0xff] }
 0x18a   :  { %1406 = vmatprep.subr.bf16.mxu0 %v1405_v40  ;;  %1502 = vmatprep.subr.bf16.mxu1 %v1501_v31  ;;  %v1509_v40 = vpack.c.bf16 %v949_v38, %v948_v37  ;;  %v1530_v30 = vpack.c.bf16 %v959_v27, %v958_v25  ;;  %v967_v37 = vld [vmem:[#allocation10 + $0x148] sm:$0xff] }
 0x18d   :  { %1408 = vmatpush1.bf16.msra.mxu0 %v1407_v45  ;;  %1504 = vmatpush3.bf16.msra.mxu1 %v1503_v2  ;;  %v1511_v45 = vpack.c.bf16 %v933_v58, %v932_v42  ;;  %v964_v2 = vld [vmem:[#allocation10 + $0x130] sm:$0xff]  ;;  %v970_v42 = vld [vmem:[#allocation10 + $0x160] sm:$0xff]  ;;  %v971_v58 = vld [vmem:[#allocation10 + $0x168] sm:$0xff] }
 0x18e   :  { %1410 = vmatprep.subr.bf16.mxu0 %v1409_v61  ;;  %1506 = vmatprep.subr.bf16.mxu1 %v1505_v18  ;;  %v1513_v61 = vpack.c.bf16 %v951_v43, %v950_v41  ;;  %v965_v18 = vld [vmem:[#allocation10 + $0x138] sm:$0xff]  ;;  %v1548_v41 = vpack.c.bf16 %v971_v58, %v970_v42  ;;  %v972_v43 = vld [vmem:[#allocation10 + $0x170] sm:$0xff] }
 0x191   :  { %1412 = vmatpush1.bf16.msra.mxu0 %v1411_v52  ;;  %v1515_v52 = vpack.c.bf16 %v935_v49, %v934_v26 }
 0x192   :  { %1414 = vmatprep.subr.bf16.mxu0 %v1413_v53  ;;  %v1517_v53 = vpack.c.bf16 %v953_v51, %v952_v50 }
 0x195   :  { %1416 = vmatpush1.bf16.msra.mxu0 %v1415_v59  ;;  %v1519_v59 = vpack.c.bf16 %v937_v55, %v936_v54 }
 0x196   :  { %1418 = vmatprep.subr.bf16.mxu0 %v1417_v60  ;;  %v1521_v60 = vpack.c.bf16 %v955_v57, %v954_v56 }
 0x199   :  { %1420 = vmatpush1.bf16.msra.mxu0 %v1419_v62  ;;  %v957_v62 = vld [vmem:[#allocation10 + $0xf8] sm:$0xff] }
 0x19a   :  { %1422 = vmatprep.subr.bf16.mxu0 %v1421_v4  ;;  %v1525_v4 = vpack.c.bf16 %v957_v62, %v956_v5 }
 0x19d   :  { %1424 = vmatpush1.bf16.msra.mxu0 %v1423_v9 }
 0x19e   :  { %1426 = vmatprep.subr.bf16.mxu0 %v1425_v10 }
 0x1a1   :  { %1428 = vmatpush1.bf16.msra.mxu0 %v1427_v16 }
 0x1a2   :  { %1430 = vmatprep.subr.bf16.mxu0 %v1429_v15 }
 0x1a5   :  { %1432 = vmatpush1.bf16.msra.mxu0 %v1431_v20  ;;  %v629_v20 = vrot.slane %v94_v12, %v1836_v44  ;;  %v962_v44 = vld [vmem:[#allocation10 + $0x120] sm:$0xff] }
 0x1a6   :  { %v1536_v34 = vpack.c.bf16 %v963_v46, %v962_v44 }
 0x1a8   :  { %777 = vmatmul.mubr.f32.vlgmr.msra.gmra.mrb[2].mxu0 %v431_v39  ;;  %v1507_v39 = vpack.c.bf16 %v931_v36, %v930_v35  ;;  %v1539_v35 = vpack.c.bf16 %v965_v18, %v964_v2  ;;  %v966_v36 = vld [vmem:[#allocation10 + $0x140] sm:$0xff] }
 0x1a9   :  { %v1542_v38 = vpack.c.bf16 %v967_v37, %v966_v36 }
 0x1aa   :  { %1508 = vmatpush3.bf16.msra.mxu1 %v1507_v39  ;;  %v968_v39 = vld [vmem:[#allocation10 + $0x150] sm:$0xff] }
 0x1ab   :  { %1510 = vmatprep.subr.bf16.mxu1 %v1509_v40  ;;  %v969_v40 = vld [vmem:[#allocation10 + $0x158] sm:$0xff] }
 0x1ae   :  { %1512 = vmatpush3.bf16.msra.mxu1 %v1511_v45  ;;  %v973_v45 = vld [vmem:[#allocation10 + $0x178] sm:$0xff] }
 0x1af   :  { %1514 = vmatprep.subr.bf16.mxu1 %v1513_v61  ;;  %v1551_v61 = vpack.c.bf16 %v973_v45, %v972_v43 }
 0x1b2   :  { %1516 = vmatpush3.bf16.msra.mxu1 %v1515_v52  ;;  %v1139_v52 = vld [vmem:[%s1936_s4 + $0x1] ss:$0 sm:$0xff] }
 0x1b3   :  { %1518 = vmatprep.subr.bf16.mxu1 %v1517_v53 }
 0x1b6   :  { %1520 = vmatpush3.bf16.msra.mxu1 %v1519_v59 }
 0x1b7   :  { %1522 = vmatprep.subr.bf16.mxu1 %v1521_v60 }
 0x1ba   :  { %1524 = vmatpush3.bf16.msra.mxu1 %v1523_v3 }
 0x1bb   :  { %1526 = vmatprep.subr.bf16.mxu1 %v1525_v4 }
 0x1be   :  { %1528 = vmatpush3.bf16.msra.mxu1 %v1527_v8 }
 0x1bf   :  { %1529 = vmatprep.subr.bf16.mxu1 %v1734_v48 }
 0x23b   :  { %v1172_v9 = vpop.f32.mrb[2].mxu1 }
 0x23c   :  { %v1173_v10 = vpop.f32.mrb[3].mxu1 }
 0x23d   :  { %v1174_v11 = vadd.f32 %v1173_v10, %v1172_v9 }
 0x23f   :  { %v850_v15 = vadd.f32 %v1174_v11, %v637_v13 }
 0x25b   :  { %v1207_v14 = vpop.f32.mrb[4].mxu1 }
 0x25c   :  { %v1208_v16 = vpop.f32.mrb[5].mxu1 }
 0x25d   :  { %v1209_v17 = vadd.f32 %v1208_v16, %v1207_v14 }
 0x25f   :  { %v920_v19 = vadd.f32 %v1209_v17, %v850_v15 }
 0x261   :  { %v925_v26 = vmax.f32 %v920_v19, 0.0 }
 0x27b   :  { %v778_v22 = vpop.f32.mrb[2].mxu0 }
 0x27c   :  { %v1553_v23 = vadd.f32 %v778_v22, %v629_v20  ;;  %v780_v24 = vpop.f32.mrb[3].mxu0 }
 0x27d   :  { %v1554_v28 = vadd.f32 %v780_v24, %v633_v21 }
 0x27e   :  { %v923_v31 = vmax.f32 %v1553_v23, 0.0 }
 0x27f   :  { %v924_v29 = vmax.f32 %v1554_v28, 0.0 }
 0x281   :  { %1042 = vmatprep.mubr.f32.mxu1 %v924_v29 }
 0x282   :  { %1043 = vmatmul.mubr.f32.vlgmr.msra.gmra.mrb[6].mxu1 %v923_v31 }
 0x283   :  { %1531 = vmatpush3.bf16.msra.mxu1 %v1530_v30  ;;  %1294 = vmatprep.mubr.msk.f32.mxu1 %vm1735_vm1, %v1733_v0  ;;  %v1545_v0 = vpack.c.bf16 %v969_v40, %v968_v39 }
 0x284   :  { %1532 = vmatprep.subr.bf16.mxu1 %v1734_v48 }
 0x287   :  { %1534 = vmatpush3.bf16.msra.mxu1 %v1533_v33 }
 0x288   :  { %1535 = vmatprep.subr.bf16.mxu1 %v1734_v48 }
 0x28b   :  { %1537 = vmatpush3.bf16.msra.mxu1 %v1536_v34 }
 0x28c   :  { %1538 = vmatprep.subr.bf16.mxu1 %v1734_v48 }
 0x28f   :  { %1540 = vmatpush3.bf16.msra.mxu1 %v1539_v35 }
 0x290   :  { %1541 = vmatprep.subr.bf16.mxu1 %v1734_v48 }
 0x293   :  { %1543 = vmatpush3.bf16.msra.mxu1 %v1542_v38 }
 0x294   :  { %1544 = vmatprep.subr.bf16.mxu1 %v1734_v48 }
 0x297   :  { %1546 = vmatpush3.bf16.msra.mxu1 %v1545_v0 }
 0x298   :  { %1547 = vmatprep.subr.bf16.mxu1 %v1734_v48 }
 0x29b   :  { %1549 = vmatpush3.bf16.msra.mxu1 %v1548_v41 }
 0x29c   :  { %1550 = vmatprep.subr.bf16.mxu1 %v1734_v48 }
 0x29f   :  { %1552 = vmatpush3.bf16.msra.mxu1 %v1551_v61 }
 0x2a2   :  { %1295 = vmatmul.mubr.f32.vlgmr.msra.gmra.mrb[8].mxu1 %v925_v26 }
 0x355   :  { %v1242_v49 = vpop.f32.mrb[6].mxu1 }
 0x356   :  { %v1243_v50 = vpop.f32.mrb[7].mxu1 }
 0x357   :  { %v1244_v51 = vadd.f32 %v1243_v50, %v1242_v49 }
 0x359   :  { %v1045_v53 = vadd.f32 %v1244_v51, %v1139_v52 }
 0x375   :  { %v1114_v54 = vpop.f32.mrb[8].mxu1 }
 0x376   :  { %v1115_v55 = vadd.f32 %v1114_v54, %v1045_v53  ;;  %v1296_v56 = vpop.f32.mrb[9].mxu1 }
 0x378   :  { %1580 = vtanh.f32 %v1115_v55 }
 0x382   :  { %v1581_v57 = vpop.eup %1580 }
 0x383   :  { %1119 = vst [vmem:[#allocation11] sm:$0xff] %v1581_v57 }
 0x384   :  { %1703 = shalt.err (!%p1700_p2)
}
 0x385   :  { %s1704_s4 = scalar_lea.hbm %s1938_s6, 128 }
 0x386   :  { %p1705_p3 = scmp.ne.s32.totalorder %s1938_s6, %s1704_s4  ;;  %p1708_p4 = scmp.lt.u32.totalorder %s1704_s4, %s1938_s6 }
 0x388   :  { %p1710_p5 = pnand %p1708_p4, %p1705_p3 }
 0x38a   :  { %1713 = shalt.err (!%p1710_p5)
}
 0x38b   :  { %1129 = dma.vmem_to_hbm [thread:$0]  %s1127_s13, 128, %s1938_s6, [#allocation4]  }
 0x38c   :  { %1720 = dma.done.wait [#allocation4], 128  }
 0x38d   :  { %1721 = vsyncadd [#allocation4], 4294967168 }
 0x38e   :  { %1133 = vsyncpa [#allocation3], 1 }
 0x38f   :  { %1134 = vsyncpa [#allocation6], 1 }
 0x390   :  { %1135 = vsyncpa [#allocation9], 1 }
 0x391   :  { %1136 = vsyncpa [#allocation4], 1 }

</bundles_post_ra>
